<compile_context>
chip_gen: v5e
topology: v5e:2x2
jax: 0.10.0
libtpu: 0.0.40
codegen_flags: <defaults>
</compile_context>

<pallas_src>
import functools
from types import SimpleNamespace

import numpy as np
import jax
import jax.numpy as jnp
from jax import lax
from jax.experimental import pallas as pl
from jax.experimental.pallas import tpu as pltpu

_MIN = 1e-15
_MIN_SQ = 1e-30
_BALL_EPS = 4e-3                      # geoopt BALL_EPS for float32
_VMEM_LIMIT = 48 * 1024 * 1024        # safe on v5e/v6e (128 MiB) and v7x (64 MiB) physical VMEM


# ---------------- kappa-stereographic math (shared by kernels & reference) ----------------

def _make_ops(k, mm_dtype):
    """Stereographic-manifold ops; k sign specializes the traced branch."""
    k = float(k)

    def inv_norm(v):
        # fused norm: one rsqrt (EUP) instead of sqrt + reciprocal
        ss = jnp.maximum(jnp.sum(v * v, axis=-1, keepdims=True), _MIN_SQ)
        inv_n = lax.rsqrt(ss)
        return ss * inv_n, inv_n      # (n ~ ||v||, 1/n)

    def tan_k(v):
        if k < 0:
            sk = float(np.sqrt(-k))
            return jnp.tanh(sk * v) * (1.0 / sk)
        if k > 0:
            sk = float(np.sqrt(k))
            return (jnp.sin(sk * v) / jnp.cos(sk * v)) * (1.0 / sk)   # exact division
        return v

    def artan_k(v):
        if k < 0:
            sk = float(np.sqrt(-k))
            z = jnp.clip(sk * v, 0.0, 1.0 - 1e-7)
            return (0.5 / sk) * jnp.log((1.0 + z) / (1.0 - z))        # exact division (artanh)
        if k > 0:
            sk = float(np.sqrt(k))
            return jnp.arctan(sk * v) * (1.0 / sk)
        return v

    def project(v):
        if k < 0:                      # clip to the open ball of radius 1/sqrt(-k)
            maxnorm = (1.0 - _BALL_EPS) / float(np.sqrt(-k))
            n, inv_n = inv_norm(v)
            return jnp.where(n > maxnorm, v * (maxnorm * inv_n), v)
        return v                       # k >= 0: no clipping (geoopt uses maxnorm=1e15)

    def expmap0(u):
        n, inv_n = inv_norm(u)
        return tan_k(n) * inv_n * u

    def logmap0(y):
        n, inv_n = inv_norm(y)
        return artan_k(n) * inv_n * y

    def mobius_add(p, q):
        p2 = jnp.sum(p * p, axis=-1, keepdims=True)
        q2 = jnp.sum(q * q, axis=-1, keepdims=True)
        pq = jnp.sum(p * q, axis=-1, keepdims=True)
        num = (1.0 - 2.0 * k * pq - k * q2) * p + (1.0 + k * p2) * q
        den = jnp.maximum(1.0 - 2.0 * k * pq + (k * k) * p2 * q2, _MIN)
        return num / den               # exact division (review correctness note)

    def mm(lhs, rhs):                  # MXU operands in mm_dtype, f32 accumulation
        return jnp.dot(lhs.astype(mm_dtype), rhs.astype(mm_dtype),
                       preferred_element_type=jnp.float32)

    def mobius_matvec(p, w_t):
        pn, inv_pn = inv_norm(p)
        mp = mm(p, w_t)
        mpn, inv_mpn = inv_norm(mp)
        # all-zero guard dropped: dense weights never give exactly-zero rows, and
        # zero input rows already produce zero through this rsqrt-fused chain.
        return tan_k(mpn * inv_pn * artan_k(pn)) * inv_mpn * mp

    def linear_log(p, w_t, kb):
        # kappaLinear (bias expmap hoisted to the wrapper) followed by logmap0
        m = project(mobius_matvec(p, w_t))
        pm = project(mobius_add(m, kb))
        return logmap0(pm)

    return SimpleNamespace(project=project, expmap0=expmap0, logmap0=logmap0,
                           mobius_add=mobius_add, mobius_matvec=mobius_matvec,
                           linear_log=linear_log)


# ---------------- Pallas kernels ----------------

def _prologue_kernel(x_ref, w_ref, kb_ref, t_ref, *, k):
    """Row-parallel: x -> manifold -> layer-1 kappaLinear -> logmap0 (tangent features t1)."""
    ops = _make_ops(k, jnp.bfloat16)
    x0 = ops.project(ops.expmap0(x_ref[...]))
    t_ref[...] = ops.linear_log(x0, w_ref[...], kb_ref[...]).astype(t_ref.dtype)


def _agg_linear_kernel(a_ref, t_ref, w_ref, kb_ref, o_ref, acc_ref, *, k):
    """Layer-1 aggregation tile  acc += A[i,k] @ t1[k]  with fused finalize:
    h = project(expmap0(acc)); then layer-2 kappaLinear + logmap0 -> t2 row block."""
    kk = pl.program_id(1)
    ops = _make_ops(k, jnp.bfloat16)

    @pl.when(kk == 0)
    def _init():
        acc_ref[...] = jnp.zeros_like(acc_ref)

    acc_ref[...] += jnp.dot(a_ref[...], t_ref[...],
                            preferred_element_type=jnp.float32)

    @pl.when(kk == pl.num_programs(1) - 1)
    def _finalize():
        h = ops.project(ops.expmap0(acc_ref[...]))
        o_ref[...] = ops.linear_log(h, w_ref[...], kb_ref[...]).astype(o_ref.dtype)


def _agg_final_kernel(a_ref, t_ref, o_ref, acc_ref, *, k):
    """Layer-2 aggregation tile with fused finalize: z = project(expmap0(acc))."""
    kk = pl.program_id(1)
    ops = _make_ops(k, jnp.bfloat16)

    @pl.when(kk == 0)
    def _init():
        acc_ref[...] = jnp.zeros_like(acc_ref)

    acc_ref[...] += jnp.dot(a_ref[...], t_ref[...],
                            preferred_element_type=jnp.float32)

    @pl.when(kk == pl.num_programs(1) - 1)
    def _finalize():
        o_ref[...] = ops.project(ops.expmap0(acc_ref[...])).astype(o_ref.dtype)


# ---------------- wrapper ----------------

def _round_up(v, m):
    return ((v + m - 1) // m) * m


def _choose_tiles(n):
    """(tm, tk, n_pad) for the A @ t aggregation; n_pad is a multiple of both tiles."""
    if n <= 512:
        t = max(_round_up(n, 16), 16)
        return t, t, t
    tm, tk = 256, 512
    return tm, tk, _round_up(n, tk)


def _kappa_bias(b, k):
    """kb = project(expmap0(proju(origin, b))) = project(expmap0(b)); hoisted per-layer const."""
    ops = _make_ops(k, jnp.float32)
    return ops.project(ops.expmap0(jnp.asarray(b, jnp.float32).reshape(1, -1)))


def encoder_forward(x, a_norm, w1, b1, w2, b2, *, k):
    """Encoder.forward.

    x      : [N, in_dim] f32 node features
    a_norm : [N, N]      D^{-1/2}(A+I)D^{-1/2} (built on host from edge_index)
    w1, w2 : torch layout [out, in]; b1, b2: [out]
    k      : curvature (shared by all three Stereographic manifolds at init)
    """
    k = float(k)
    N, in_dim = x.shape
    hidden_dim = w1.shape[0]
    out_dim = w2.shape[0]

    # lane-dense padded feature dims (zero padding is inert for all norm-based ops)
    in_p = _round_up(in_dim, 128)
    hid_p = _round_up(hidden_dim, 128)
    out_p = _round_up(out_dim, 128)

    tm, tk, n_pad = _choose_tiles(N)
    grid_i, grid_k = n_pad // tm, n_pad // tk

    f32 = jnp.float32
    xp = jnp.zeros((n_pad, in_p), f32).at[:N, :in_dim].set(jnp.asarray(x, f32))
    ap = jnp.zeros((n_pad, n_pad), f32).at[:N, :N].set(
        jnp.asarray(a_norm, f32)).astype(jnp.bfloat16)            # MXU / HBM-stream operand
    w1p = jnp.zeros((in_p, hid_p), f32).at[:in_dim, :hidden_dim].set(
        jnp.asarray(w1, f32).T).astype(jnp.bfloat16)
    w2p = jnp.zeros((hid_p, out_p), f32).at[:hidden_dim, :out_dim].set(
        jnp.asarray(w2, f32).T).astype(jnp.bfloat16)
    kb1 = jnp.zeros((1, hid_p), f32).at[:, :hidden_dim].set(_kappa_bias(b1, k))
    kb2 = jnp.zeros((1, out_p), f32).at[:, :out_dim].set(_kappa_bias(b2, k))

    row_params = pltpu.CompilerParams(
        dimension_semantics=("parallel",), vmem_limit_bytes=_VMEM_LIMIT)
    agg_params = pltpu.CompilerParams(
        dimension_semantics=("parallel", "arbitrary"), vmem_limit_bytes=_VMEM_LIMIT)

    # ---- layer-1 prologue: t1 = logmap0(kappaLinear(expmap0(x)))  (row tiled) ----
    t1 = pl.pallas_call(
        functools.partial(_prologue_kernel, k=k),
        out_shape=jax.ShapeDtypeStruct((n_pad, hid_p), jnp.bfloat16),
        grid_spec=pltpu.PrefetchScalarGridSpec(
            num_scalar_prefetch=0, grid=(grid_i,),
            in_specs=[pl.BlockSpec((tm, in_p), lambda i: (i, 0)),
                      pl.BlockSpec((in_p, hid_p), lambda i: (0, 0)),
                      pl.BlockSpec((1, hid_p), lambda i: (0, 0))],
            out_specs=pl.BlockSpec((tm, hid_p), lambda i: (i, 0))),
        compiler_params=row_params,
        cost_estimate=pl.CostEstimate(
            flops=int(2 * n_pad * in_p * hid_p),
            transcendentals=int(10 * n_pad),
            bytes_accessed=int(n_pad * (in_p * 4 + hid_p * 2))),
    )(xp, w1p, kb1)

    # ---- layer-1 aggregation + fused layer-2 kappaLinear/logmap0 -> t2 ----
    t2 = pl.pallas_call(
        functools.partial(_agg_linear_kernel, k=k),
        out_shape=jax.ShapeDtypeStruct((n_pad, out_p), jnp.bfloat16),
        grid_spec=pltpu.PrefetchScalarGridSpec(
            num_scalar_prefetch=0, grid=(grid_i, grid_k),
            in_specs=[pl.BlockSpec((tm, tk), lambda i, kk: (i, kk)),
                      pl.BlockSpec((tk, hid_p), lambda i, kk: (kk, 0)),
                      pl.BlockSpec((hid_p, out_p), lambda i, kk: (0, 0)),
                      pl.BlockSpec((1, out_p), lambda i, kk: (0, 0))],
            out_specs=pl.BlockSpec((tm, out_p), lambda i, kk: (i, 0)),
            scratch_shapes=[pltpu.VMEM((tm, hid_p), jnp.float32)]),
        compiler_params=agg_params,
        cost_estimate=pl.CostEstimate(
            flops=int(2 * n_pad * n_pad * hid_p + 2 * n_pad * hid_p * out_p),
            transcendentals=int(14 * n_pad),
            bytes_accessed=int(n_pad * n_pad * 2 + n_pad * (hid_p + out_p) * 2)),
    )(ap, t1, w2p, kb2)

    # ---- layer-2 aggregation + final expmap0/project -> z ----
    z = pl.pallas_call(
        functools.partial(_agg_final_kernel, k=k),
        out_shape=jax.ShapeDtypeStruct((n_pad, out_p), jnp.float32),
        grid_spec=pltpu.PrefetchScalarGridSpec(
            num_scalar_prefetch=0, grid=(grid_i, grid_k),
            in_specs=[pl.BlockSpec((tm, tk), lambda i, kk: (i, kk)),
                      pl.BlockSpec((tk, out_p), lambda i, kk: (kk, 0))],
            out_specs=pl.BlockSpec((tm, out_p), lambda i, kk: (i, 0)),
            scratch_shapes=[pltpu.VMEM((tm, out_p), jnp.float32)]),
        compiler_params=agg_params,
        cost_estimate=pl.CostEstimate(
            flops=int(2 * n_pad * n_pad * out_p),
            transcendentals=int(6 * n_pad),
            bytes_accessed=int(n_pad * n_pad * 2 + n_pad * out_p * 6)),
    )(ap, t2)

    return z[:N, :out_dim]


# ---------------- pure-JAX f32 reference (exact division path is shared) ----------------

def _encoder_reference(x, a, w1, b1, w2, b2, *, k):
    ops = _make_ops(float(k), jnp.float32)

    def conv(p, w, b):
        kb = ops.project(ops.expmap0(jnp.asarray(b, jnp.float32).reshape(1, -1)))
        t = ops.linear_log(p, jnp.asarray(w, jnp.float32).T, kb)
        return ops.project(ops.expmap0(jnp.dot(a, t)))

    x0 = ops.project(ops.expmap0(jnp.asarray(x, jnp.float32)))
    return conv(conv(x0, w1, b1), w2, b2)


# ---------------- host glue: dense GCN-normalized adjacency ----------------

def build_norm_adj(edge_index, num_nodes):
    # PyG: add_self_loops; deg = degree(col); norm = deg^-1/2[row] * deg^-1/2[col]
    A = np.zeros((num_nodes, num_nodes), dtype=np.float32)
    src, dst = edge_index
    A[dst, src] = 1.0                 # message j -> i lands in row i, column j
    A = A + np.eye(num_nodes, dtype=np.float32)
    deg = A.sum(axis=1)
    dinv = 1.0 / np.sqrt(np.maximum(deg, 1e-12))
    return (dinv[:, None] * A) * dinv[None, :]


if __name__ == "__main__":
    key = jax.random.PRNGKey(0)
    k_curv = -1.0                      # hyperbolic curvature (geoopt.Stereographic(k=-1))
    N, in_dim, hidden_dim, out_dim = 16, 8, 32, 8

    ks = jax.random.split(key, 5)
    x = jax.random.normal(ks[0], (N, in_dim), jnp.float32) * 0.1
    # torch layout: weight [out, in], bias [out]
    w1 = jax.random.normal(ks[1], (hidden_dim, in_dim), jnp.float32) * 0.1
    b1 = jax.random.normal(ks[2], (hidden_dim,), jnp.float32) * 0.05
    w2 = jax.random.normal(ks[3], (out_dim, hidden_dim), jnp.float32) * 0.1
    b2 = jax.random.normal(ks[4], (out_dim,), jnp.float32) * 0.05

    # undirected ring graph over N nodes (no pre-existing self loops)
    src = np.concatenate([np.arange(N), (np.arange(N) + 1) % N])
    dst = np.concatenate([(np.arange(N) + 1) % N, np.arange(N)])
    edge_index = np.stack([src, dst]).astype(np.int64)
    a_norm = jnp.asarray(build_norm_adj(edge_index, N))

    z = encoder_forward(x, a_norm, w1, b1, w2, b2, k=k_curv)
    z = jax.block_until_ready(z)

    ref = _encoder_reference(x, a_norm, w1, b1, w2, b2, k=k_curv)

    assert z.shape == (N, out_dim)
    assert bool(jnp.all(jnp.isfinite(z)))
    # outputs must lie inside the kappa-ball of radius 1/sqrt(-k)
    assert float(jnp.max(jnp.linalg.norm(z, axis=-1))) <= 1.0 / np.sqrt(-k_curv) + 1e-3
    np.testing.assert_allclose(np.asarray(z), np.asarray(ref), atol=3e-2, rtol=3e-2)
    print("KERNEL_OK")
</pallas_src>

<mosaic_0001>
module attributes {stable_mosaic.version = 11 : i64} {
  func.func @_prologue_kernel(%arg0: i32, %arg1: memref<16x128xf32, #tpu.memory_space<vmem>>, %arg2: memref<128x128xbf16, #tpu.memory_space<vmem>>, %arg3: memref<1x128xf32, #tpu.memory_space<vmem>>, %arg4: memref<16x128xbf16, #tpu.memory_space<vmem>>) attributes {dimension_semantics = [#tpu.dimension_semantics<parallel>], iteration_bounds = array<i64: 1>, scalar_prefetch = 0 : i64, scratch_operands = 0 : i64, tpu.core_type = #tpu.core_type<tc>, window_params = [{transform_indices = @transform_0, window_bounds = array<i64: 16, 128>}, {pipeline_mode = #tpu.pipeline_mode<synchronous>, transform_indices = @transform_1, window_bounds = array<i64: 128, 128>}, {pipeline_mode = #tpu.pipeline_mode<synchronous>, transform_indices = @transform_2, window_bounds = array<i64: 1, 128>}, {transform_indices = @transform_3, window_bounds = array<i64: 16, 128>}]} {
    %c0 = arith.constant 0 : index
    %c0_0 = arith.constant 0 : index
    %0 = vector.load %arg1[%c0, %c0_0] : memref<16x128xf32, #tpu.memory_space<vmem>>, vector<16x128xf32>
    %1 = arith.mulf %0, %0 : vector<16x128xf32>
    %cst = arith.constant dense<0.000000e+00> : vector<16xf32>
    %2 = vector.multi_reduction <add>, %1, %cst [1] : vector<16x128xf32> to vector<16xf32>
    %3 = vector.shape_cast %2 : vector<16xf32> to vector<16x1xf32>
    %cst_1 = arith.constant 1.000000e-30 : f32
    %4 = vector.broadcast %cst_1 : f32 to vector<16x1xf32>
    %5 = arith.maximumf %3, %4 : vector<16x1xf32>
    %6 = math.rsqrt %5 : vector<16x1xf32>
    %7 = arith.mulf %5, %6 : vector<16x1xf32>
    %cst_2 = arith.constant 1.000000e+00 : f32
    %8 = vector.broadcast %cst_2 : f32 to vector<16x1xf32>
    %9 = arith.mulf %8, %7 : vector<16x1xf32>
    %10 = math.tanh %9 : vector<16x1xf32>
    %cst_3 = arith.constant 1.000000e+00 : f32
    %11 = vector.broadcast %cst_3 : f32 to vector<16x1xf32>
    %12 = arith.mulf %10, %11 : vector<16x1xf32>
    %13 = arith.mulf %12, %6 : vector<16x1xf32>
    %14 = vector.broadcast %13 : vector<16x1xf32> to vector<16x128xf32>
    %15 = arith.mulf %14, %0 : vector<16x128xf32>
    %16 = arith.mulf %15, %15 : vector<16x128xf32>
    %cst_4 = arith.constant dense<0.000000e+00> : vector<16xf32>
    %17 = vector.multi_reduction <add>, %16, %cst_4 [1] : vector<16x128xf32> to vector<16xf32>
    %18 = vector.shape_cast %17 : vector<16xf32> to vector<16x1xf32>
    %cst_5 = arith.constant 1.000000e-30 : f32
    %19 = vector.broadcast %cst_5 : f32 to vector<16x1xf32>
    %20 = arith.maximumf %18, %19 : vector<16x1xf32>
    %21 = math.rsqrt %20 : vector<16x1xf32>
    %22 = arith.mulf %20, %21 : vector<16x1xf32>
    %cst_6 = arith.constant 0.995999991 : f32
    %23 = vector.broadcast %cst_6 : f32 to vector<16x1xf32>
    %24 = arith.cmpf ogt, %22, %23 : vector<16x1xf32>
    %cst_7 = arith.constant 0.995999991 : f32
    %25 = vector.broadcast %cst_7 : f32 to vector<16x1xf32>
    %26 = arith.mulf %25, %21 : vector<16x1xf32>
    %27 = vector.broadcast %26 : vector<16x1xf32> to vector<16x128xf32>
    %28 = arith.mulf %15, %27 : vector<16x128xf32>
    %29 = vector.shape_cast %24 : vector<16x1xi1> to vector<16x1xi1>
    %30 = vector.broadcast %29 : vector<16x1xi1> to vector<16x128xi1>
    %31 = arith.select %30, %28, %15 : vector<16x128xi1>, vector<16x128xf32>
    %c0_8 = arith.constant 0 : index
    %c0_9 = arith.constant 0 : index
    %32 = vector.load %arg2[%c0_8, %c0_9] : memref<128x128xbf16, #tpu.memory_space<vmem>>, vector<128x128xbf16>
    %c0_10 = arith.constant 0 : index
    %c0_11 = arith.constant 0 : index
    %33 = vector.load %arg3[%c0_10, %c0_11] : memref<1x128xf32, #tpu.memory_space<vmem>>, vector<1x128xf32>
    %34 = arith.mulf %31, %31 : vector<16x128xf32>
    %cst_12 = arith.constant dense<0.000000e+00> : vector<16xf32>
    %35 = vector.multi_reduction <add>, %34, %cst_12 [1] : vector<16x128xf32> to vector<16xf32>
    %36 = vector.shape_cast %35 : vector<16xf32> to vector<16x1xf32>
    %cst_13 = arith.constant 1.000000e-30 : f32
    %37 = vector.broadcast %cst_13 : f32 to vector<16x1xf32>
    %38 = arith.maximumf %36, %37 : vector<16x1xf32>
    %39 = math.rsqrt %38 : vector<16x1xf32>
    %40 = arith.mulf %38, %39 : vector<16x1xf32>
    %41 = arith.truncf %31 : vector<16x128xf32> to vector<16x128xbf16>
    %cst_14 = arith.constant dense<0.000000e+00> : vector<16x128xf32>
    %42 = tpu.matmul %41, %32, %cst_14 {dimension_numbers = #tpu.dot_dimension_numbers<[1], [0], [0], [1], [0, 0, 1, 1], [], []>} : vector<16x128xbf16>, vector<128x128xbf16>, vector<16x128xf32> -> vector<16x128xf32>
    %43 = arith.mulf %42, %42 : vector<16x128xf32>
    %cst_15 = arith.constant dense<0.000000e+00> : vector<16xf32>
    %44 = vector.multi_reduction <add>, %43, %cst_15 [1] : vector<16x128xf32> to vector<16xf32>
    %45 = vector.shape_cast %44 : vector<16xf32> to vector<16x1xf32>
    %cst_16 = arith.constant 1.000000e-30 : f32
    %46 = vector.broadcast %cst_16 : f32 to vector<16x1xf32>
    %47 = arith.maximumf %45, %46 : vector<16x1xf32>
    %48 = math.rsqrt %47 : vector<16x1xf32>
    %49 = arith.mulf %47, %48 : vector<16x1xf32>
    %50 = arith.mulf %49, %39 : vector<16x1xf32>
    %cst_17 = arith.constant 1.000000e+00 : f32
    %51 = vector.broadcast %cst_17 : f32 to vector<16x1xf32>
    %52 = arith.mulf %51, %40 : vector<16x1xf32>
    %cst_18 = arith.constant 0.000000e+00 : f32
    %cst_19 = arith.constant 0.99999988 : f32
    %53 = vector.broadcast %cst_18 : f32 to vector<16x1xf32>
    %54 = arith.maximumf %53, %52 : vector<16x1xf32>
    %55 = vector.broadcast %cst_19 : f32 to vector<16x1xf32>
    %56 = arith.minimumf %55, %54 : vector<16x1xf32>
    %cst_20 = arith.constant 1.000000e+00 : f32
    %57 = vector.broadcast %cst_20 : f32 to vector<16x1xf32>
    %58 = arith.addf %57, %56 : vector<16x1xf32>
    %cst_21 = arith.constant 1.000000e+00 : f32
    %59 = vector.broadcast %cst_21 : f32 to vector<16x1xf32>
    %60 = arith.subf %59, %56 : vector<16x1xf32>
    %61 = arith.divf %58, %60 : vector<16x1xf32>
    %62 = math.log %61 : vector<16x1xf32>
    %cst_22 = arith.constant 5.000000e-01 : f32
    %63 = vector.broadcast %cst_22 : f32 to vector<16x1xf32>
    %64 = arith.mulf %63, %62 : vector<16x1xf32>
    %65 = arith.mulf %50, %64 : vector<16x1xf32>
    %cst_23 = arith.constant 1.000000e+00 : f32
    %66 = vector.broadcast %cst_23 : f32 to vector<16x1xf32>
    %67 = arith.mulf %66, %65 : vector<16x1xf32>
    %68 = math.tanh %67 : vector<16x1xf32>
    %cst_24 = arith.constant 1.000000e+00 : f32
    %69 = vector.broadcast %cst_24 : f32 to vector<16x1xf32>
    %70 = arith.mulf %68, %69 : vector<16x1xf32>
    %71 = arith.mulf %70, %48 : vector<16x1xf32>
    %72 = vector.broadcast %71 : vector<16x1xf32> to vector<16x128xf32>
    %73 = arith.mulf %72, %42 : vector<16x128xf32>
    %74 = arith.mulf %73, %73 : vector<16x128xf32>
    %cst_25 = arith.constant dense<0.000000e+00> : vector<16xf32>
    %75 = vector.multi_reduction <add>, %74, %cst_25 [1] : vector<16x128xf32> to vector<16xf32>
    %76 = vector.shape_cast %75 : vector<16xf32> to vector<16x1xf32>
    %cst_26 = arith.constant 1.000000e-30 : f32
    %77 = vector.broadcast %cst_26 : f32 to vector<16x1xf32>
    %78 = arith.maximumf %76, %77 : vector<16x1xf32>
    %79 = math.rsqrt %78 : vector<16x1xf32>
    %80 = arith.mulf %78, %79 : vector<16x1xf32>
    %cst_27 = arith.constant 0.995999991 : f32
    %81 = vector.broadcast %cst_27 : f32 to vector<16x1xf32>
    %82 = arith.cmpf ogt, %80, %81 : vector<16x1xf32>
    %cst_28 = arith.constant 0.995999991 : f32
    %83 = vector.broadcast %cst_28 : f32 to vector<16x1xf32>
    %84 = arith.mulf %83, %79 : vector<16x1xf32>
    %85 = vector.broadcast %84 : vector<16x1xf32> to vector<16x128xf32>
    %86 = arith.mulf %73, %85 : vector<16x128xf32>
    %87 = vector.shape_cast %82 : vector<16x1xi1> to vector<16x1xi1>
    %88 = vector.broadcast %87 : vector<16x1xi1> to vector<16x128xi1>
    %89 = arith.select %88, %86, %73 : vector<16x128xi1>, vector<16x128xf32>
    %90 = arith.mulf %89, %89 : vector<16x128xf32>
    %cst_29 = arith.constant dense<0.000000e+00> : vector<16xf32>
    %91 = vector.multi_reduction <add>, %90, %cst_29 [1] : vector<16x128xf32> to vector<16xf32>
    %92 = vector.shape_cast %91 : vector<16xf32> to vector<16x1xf32>
    %93 = arith.mulf %33, %33 : vector<1x128xf32>
    %cst_30 = arith.constant dense<0.000000e+00> : vector<1xf32>
    %94 = vector.multi_reduction <add>, %93, %cst_30 [1] : vector<1x128xf32> to vector<1xf32>
    %95 = vector.shape_cast %94 : vector<1xf32> to vector<1x1xf32>
    %96 = vector.broadcast %33 : vector<1x128xf32> to vector<16x128xf32>
    %97 = arith.mulf %89, %96 : vector<16x128xf32>
    %cst_31 = arith.constant dense<0.000000e+00> : vector<16xf32>
    %98 = vector.multi_reduction <add>, %97, %cst_31 [1] : vector<16x128xf32> to vector<16xf32>
    %99 = vector.shape_cast %98 : vector<16xf32> to vector<16x1xf32>
    %cst_32 = arith.constant -2.000000e+00 : f32
    %100 = vector.broadcast %cst_32 : f32 to vector<16x1xf32>
    %101 = arith.mulf %100, %99 : vector<16x1xf32>
    %cst_33 = arith.constant 1.000000e+00 : f32
    %102 = vector.broadcast %cst_33 : f32 to vector<16x1xf32>
    %103 = arith.subf %102, %101 : vector<16x1xf32>
    %cst_34 = arith.constant -1.000000e+00 : f32
    %104 = vector.broadcast %cst_34 : f32 to vector<1x1xf32>
    %105 = arith.mulf %104, %95 : vector<1x1xf32>
    %106 = vector.broadcast %105 : vector<1x1xf32> to vector<16x1xf32>
    %107 = arith.subf %103, %106 : vector<16x1xf32>
    %108 = vector.broadcast %107 : vector<16x1xf32> to vector<16x128xf32>
    %109 = arith.mulf %108, %89 : vector<16x128xf32>
    %cst_35 = arith.constant -1.000000e+00 : f32
    %110 = vector.broadcast %cst_35 : f32 to vector<16x1xf32>
    %111 = arith.mulf %110, %92 : vector<16x1xf32>
    %cst_36 = arith.constant 1.000000e+00 : f32
    %112 = vector.broadcast %cst_36 : f32 to vector<16x1xf32>
    %113 = arith.addf %112, %111 : vector<16x1xf32>
    %114 = vector.broadcast %113 : vector<16x1xf32> to vector<16x128xf32>
    %115 = vector.broadcast %33 : vector<1x128xf32> to vector<16x128xf32>
    %116 = arith.mulf %114, %115 : vector<16x128xf32>
    %117 = arith.addf %109, %116 : vector<16x128xf32>
    %cst_37 = arith.constant -2.000000e+00 : f32
    %118 = vector.broadcast %cst_37 : f32 to vector<16x1xf32>
    %119 = arith.mulf %118, %99 : vector<16x1xf32>
    %cst_38 = arith.constant 1.000000e+00 : f32
    %120 = vector.broadcast %cst_38 : f32 to vector<16x1xf32>
    %121 = arith.subf %120, %119 : vector<16x1xf32>
    %cst_39 = arith.constant 1.000000e+00 : f32
    %122 = vector.broadcast %cst_39 : f32 to vector<16x1xf32>
    %123 = arith.mulf %122, %92 : vector<16x1xf32>
    %124 = vector.broadcast %95 : vector<1x1xf32> to vector<16x1xf32>
    %125 = arith.mulf %123, %124 : vector<16x1xf32>
    %126 = arith.addf %121, %125 : vector<16x1xf32>
    %cst_40 = arith.constant 1.000000e-15 : f32
    %127 = vector.broadcast %cst_40 : f32 to vector<16x1xf32>
    %128 = arith.maximumf %126, %127 : vector<16x1xf32>
    %129 = vector.broadcast %128 : vector<16x1xf32> to vector<16x128xf32>
    %130 = arith.divf %117, %129 : vector<16x128xf32>
    %131 = arith.mulf %130, %130 : vector<16x128xf32>
    %cst_41 = arith.constant dense<0.000000e+00> : vector<16xf32>
    %132 = vector.multi_reduction <add>, %131, %cst_41 [1] : vector<16x128xf32> to vector<16xf32>
    %133 = vector.shape_cast %132 : vector<16xf32> to vector<16x1xf32>
    %cst_42 = arith.constant 1.000000e-30 : f32
    %134 = vector.broadcast %cst_42 : f32 to vector<16x1xf32>
    %135 = arith.maximumf %133, %134 : vector<16x1xf32>
    %136 = math.rsqrt %135 : vector<16x1xf32>
    %137 = arith.mulf %135, %136 : vector<16x1xf32>
    %cst_43 = arith.constant 0.995999991 : f32
    %138 = vector.broadcast %cst_43 : f32 to vector<16x1xf32>
    %139 = arith.cmpf ogt, %137, %138 : vector<16x1xf32>
    %cst_44 = arith.constant 0.995999991 : f32
    %140 = vector.broadcast %cst_44 : f32 to vector<16x1xf32>
    %141 = arith.mulf %140, %136 : vector<16x1xf32>
    %142 = vector.broadcast %141 : vector<16x1xf32> to vector<16x128xf32>
    %143 = arith.mulf %130, %142 : vector<16x128xf32>
    %144 = vector.shape_cast %139 : vector<16x1xi1> to vector<16x1xi1>
    %145 = vector.broadcast %144 : vector<16x1xi1> to vector<16x128xi1>
    %146 = arith.select %145, %143, %130 : vector<16x128xi1>, vector<16x128xf32>
    %147 = arith.mulf %146, %146 : vector<16x128xf32>
    %cst_45 = arith.constant dense<0.000000e+00> : vector<16xf32>
    %148 = vector.multi_reduction <add>, %147, %cst_45 [1] : vector<16x128xf32> to vector<16xf32>
    %149 = vector.shape_cast %148 : vector<16xf32> to vector<16x1xf32>
    %cst_46 = arith.constant 1.000000e-30 : f32
    %150 = vector.broadcast %cst_46 : f32 to vector<16x1xf32>
    %151 = arith.maximumf %149, %150 : vector<16x1xf32>
    %152 = math.rsqrt %151 : vector<16x1xf32>
    %153 = arith.mulf %151, %152 : vector<16x1xf32>
    %cst_47 = arith.constant 1.000000e+00 : f32
    %154 = vector.broadcast %cst_47 : f32 to vector<16x1xf32>
    %155 = arith.mulf %154, %153 : vector<16x1xf32>
    %cst_48 = arith.constant 0.000000e+00 : f32
    %cst_49 = arith.constant 0.99999988 : f32
    %156 = vector.broadcast %cst_48 : f32 to vector<16x1xf32>
    %157 = arith.maximumf %156, %155 : vector<16x1xf32>
    %158 = vector.broadcast %cst_49 : f32 to vector<16x1xf32>
    %159 = arith.minimumf %158, %157 : vector<16x1xf32>
    %cst_50 = arith.constant 1.000000e+00 : f32
    %160 = vector.broadcast %cst_50 : f32 to vector<16x1xf32>
    %161 = arith.addf %160, %159 : vector<16x1xf32>
    %cst_51 = arith.constant 1.000000e+00 : f32
    %162 = vector.broadcast %cst_51 : f32 to vector<16x1xf32>
    %163 = arith.subf %162, %159 : vector<16x1xf32>
    %164 = arith.divf %161, %163 : vector<16x1xf32>
    %165 = math.log %164 : vector<16x1xf32>
    %cst_52 = arith.constant 5.000000e-01 : f32
    %166 = vector.broadcast %cst_52 : f32 to vector<16x1xf32>
    %167 = arith.mulf %166, %165 : vector<16x1xf32>
    %168 = arith.mulf %167, %152 : vector<16x1xf32>
    %169 = vector.broadcast %168 : vector<16x1xf32> to vector<16x128xf32>
    %170 = arith.mulf %169, %146 : vector<16x128xf32>
    %171 = arith.truncf %170 : vector<16x128xf32> to vector<16x128xbf16>
    %c0_53 = arith.constant 0 : index
    %c0_54 = arith.constant 0 : index
    %172 = vector.load %arg4[%c0_53, %c0_54] : memref<16x128xbf16, #tpu.memory_space<vmem>>, vector<16x128xbf16>
    tpu.vector_store %arg4[%c0_53, %c0_54], %171 {strides = array<i32>} : memref<16x128xbf16, #tpu.memory_space<vmem>>, vector<16x128xbf16>,
    return
  }
  func.func @transform_0(%arg0: i32) -> (i32, i32) {
    %c0_i32 = arith.constant 0 : i32
    %c0_i32_0 = arith.constant 0 : i32
    return %arg0, %c0_i32 : i32, i32
  }
  func.func @transform_1(%arg0: i32) -> (i32, i32) {
    %c0_i32 = arith.constant 0 : i32
    %c0_i32_0 = arith.constant 0 : i32
    %c0_i32_1 = arith.constant 0 : i32
    return %c0_i32, %c0_i32_0 : i32, i32
  }
  func.func @transform_2(%arg0: i32) -> (i32, i32) {
    %c0_i32 = arith.constant 0 : i32
    %c0_i32_0 = arith.constant 0 : i32
    %c0_i32_1 = arith.constant 0 : i32
    return %c0_i32, %c0_i32_0 : i32, i32
  }
  func.func @transform_3(%arg0: i32) -> (i32, i32) {
    %c0_i32 = arith.constant 0 : i32
    %c0_i32_0 = arith.constant 0 : i32
    return %arg0, %c0_i32 : i32, i32
  }
}

</mosaic_0001>

<bundles_post_ra>
// kernel: tpu_custom_call.1
= control target key start
LH: loop header
LB: loop body
LE: loop exit
PB: predicated region body
PF: predicated region fallthrough
CT: control target
= control target key end

     0   :  { %8 = vsyncpa [#allocation3], 0  ;;  %s851_s0 = inlined_call_operand.hbm [shape: f32[16,128], index: 0, kind: input, shape index: {}]   ;;  %s852_s1 = inlined_call_operand.hbm [shape: bf16[128,128], index: 1, kind: input, shape index: {}]   ;;  %s853_s2 = inlined_call_operand.vmem [shape: f32[1,128], index: 2, kind: input, shape index: {}]   ;;  %s854_s3 = inlined_call_operand.hbm [shape: bf16[16,128], index: 3, kind: output, shape index: {}]  }
   0x1   :  { %9 = vsyncpa [#allocation6], 0 }
   0x2   :  { %10 = vsyncpa [#allocation4], 0  ;;  %s15_s14 = sshll.u32 %s851_s0, 4  ;;  %s769_s15 = smov [#allocation2]   ;;  %s16_s14 = int_to_ptr.hbm [resolvable:$true] %s15_s14 }
   0x3   :  { %s17_s16 = sshll.u32 %s769_s15, 4  ;;  %s28_s19 = sshll.u32 %s852_s1, 4  ;;  %s18_s16 = int_to_ptr.vmem [resolvable:$true] %s17_s16  ;;  %s29_s19 = int_to_ptr.hbm [resolvable:$true] %s28_s19 }
   0x4   :  { %s770_s20 = smov 128   ;;  %s771_s21 = smov 8  }
   0x5   :  { %23 = dma.hbm_to_vmem [thread:$0]  %s16_s14, 256, %s18_s16, [#allocation3], %s770_s20, %s770_s20, %s771_s21  }
   0x6   :  { %s772_s22 = smov [#allocation5]   ;;  %s773_s24 = smov 64  }
   0x7   :  { %s30_s23 = sshll.u32 %s772_s22, 4  ;;  %s774_s25 = smov 4   ;;  %s31_s23 = int_to_ptr.vmem [resolvable:$true] %s30_s23 }
   0x8   :  { %36 = dma.hbm_to_vmem [thread:$0]  %s29_s19, 1024, %s31_s23, [#allocation6], %s773_s24, %s773_s24, %s774_s25  }
   0x9   :  { %763 = dma.done.wait [#allocation3], 256  }
   0xa   :  { %764 = vsyncadd [#allocation3], 4294967040 }
   0xb   :  { %765 = dma.done.wait [#allocation6], 1024  }
   0xc   :  { %766 = vsyncadd [#allocation6], 4294966272  ;;  %v47_v0 = vld [vmem:[#allocation2] sm:$0xff]  ;;  %v48_v2 = vld [vmem:[#allocation2 + $0x8] sm:$0xff]  ;;  %s568_s4 = sshll.u32 %s854_s3, 4  ;;  %s569_s4 = int_to_ptr.hbm [resolvable:$true] %s568_s4 }
   0xd   :  { %v49_v1 = vmul.f32 %v47_v0, %v47_v0  ;;  %v50_v3 = vmul.f32 %v48_v2, %v48_v2  ;;  %v621_v32 = vld [vmem:[#allocation5 + $0x38] sm:$0xff]  ;;  %v620_v33 = vld [vmem:[#allocation5 + $0x30] sm:$0xff]  ;;  %v619_v34 = vld [vmem:[#allocation5 + $0x28] sm:$0xff] }
   0xe   :  { %223 = vmatpush.bf16.msra.mxu0 %v621_v32  ;;  %v618_v35 = vld [vmem:[#allocation5 + $0x20] sm:$0xff]  ;;  %v617_v36 = vld [vmem:[#allocation5 + $0x18] sm:$0xff]  ;;  %v616_v37 = vld [vmem:[#allocation5 + $0x10] sm:$0xff] }
   0xf   :  { %51 = vadd.xlane.f32.xlu0 %v49_v1  ;;  %v615_v38 = vld [vmem:[#allocation5 + $0x8] sm:$0xff]  ;;  %v614_v39 = vld [vmem:[#allocation5] sm:$0xff] }
  0x12   :  { %224 = vmatpush.bf16.msra.mxu0 %v620_v33 }
  0x16   :  { %225 = vmatpush.bf16.msra.mxu0 %v619_v34 }
  0x17   :  { %53 = vadd.xlane.f32.xlu0 %v50_v3 }
  0x1a   :  { %226 = vmatpush.bf16.msra.mxu0 %v618_v35 }
  0x1e   :  { %227 = vmatpush.bf16.msra.mxu0 %v617_v36 }
  0x22   :  { %228 = vmatpush.bf16.msra.mxu0 %v616_v37 }
  0x26   :  { %229 = vmatpush.bf16.msra.mxu0 %v615_v38 }
  0x2a   :  { %230 = vmatpush.bf16.msra.mxu0 %v614_v39 }
  0x82   :  { %v52_v4 = vpop.xlane.xlu0 %51 }
  0x83   :  { %v55_v5 = vmax.f32 %v52_v4, 1e-30 }
  0x85   :  { %635 = vrsqrt.f32 %v55_v5  ;;  %vm63_vm1 = vweird.f32 %v55_v5 }
  0x8a   :  { %v54_v6 = vpop.xlane.xlu0 %53 }
  0x8b   :  { %v636_v7 = vpop.eup %635  ;;  %v56_v8 = vmax.f32 %v54_v6, 1e-30 }
  0x8c   :  { %v58_v9 = vmul.f32 %v636_v7, %v55_v5  ;;  %vm64_vm0 = vweird.f32 %v636_v7 }
  0x8d   :  { %637 = vrsqrt.f32 %v56_v8  ;;  %vm65_vm2 = vmor %vm63_vm1, %vm64_vm0  ;;  %vm73_vm4 = vweird.f32 %v56_v8 }
  0x8e   :  { %v59_v10 = vmul.f32 %v636_v7, %v58_v9 }
  0x90   :  { %v60_v11 = vmul.f32 0.5, %v59_v10 }
  0x92   :  { %v61_v12 = vsub.f32 1.5, %v60_v11 }
  0x93   :  { %v638_v13 = vpop.eup %637 }
  0x94   :  { %v68_v14 = vmul.f32 %v638_v13, %v56_v8  ;;  %v62_v15 = vmul.f32 %v636_v7, %v61_v12  ;;  %vm74_vm3 = vweird.f32 %v638_v13 }
  0x95   :  { %vm75_vm5 = vmor %vm73_vm4, %vm74_vm3 }
  0x96   :  { %v69_v16 = vmul.f32 %v638_v13, %v68_v14  ;;  %v66_v17 = vsel %vm65_vm2, %v636_v7, %v62_v15 }
  0x97   :  { %v77_v18 = vmul.f32 %v66_v17, %v55_v5 }
  0x98   :  { %v70_v19 = vmul.f32 0.5, %v69_v16 }
  0x99   :  { %639 = vtanh.f32 %v77_v18 }
  0x9a   :  { %v71_v20 = vsub.f32 1.5, %v70_v19 }
  0x9c   :  { %v72_v21 = vmul.f32 %v638_v13, %v71_v20 }
  0x9e   :  { %v76_v22 = vsel %vm75_vm5, %v638_v13, %v72_v21 }
  0x9f   :  { %v640_v23 = vpop.eup %639  ;;  %v78_v24 = vmul.f32 %v76_v22, %v56_v8 }
  0xa0   :  { %v81_v25 = vmul.f32 %v640_v23, %v66_v17 }
  0xa1   :  { %641 = vtanh.f32 %v78_v24 }
  0xa2   :  { %v83_v26 = vmul.f32 %v81_v25, %v47_v0 }
  0xa4   :  { %v85_v27 = vmul.f32 %v83_v26, %v83_v26 }
  0xa6   :  { %87 = vadd.xlane.f32.xlu1 %v85_v27 }
  0xa7   :  { %v642_v28 = vpop.eup %641 }
  0xa8   :  { %v82_v29 = vmul.f32 %v642_v28, %v76_v22 }
  0xaa   :  { %v84_v30 = vmul.f32 %v82_v29, %v48_v2 }
  0xac   :  { %v86_v31 = vmul.f32 %v84_v30, %v84_v30 }
  0xae   :  { %89 = vadd.xlane.f32.xlu1 %v86_v31 }
 0x119   :  { %v88_v40 = vpop.xlane.xlu1 %87 }
 0x11a   :  { %v91_v41 = vmax.f32 %v88_v40, 1e-30 }
 0x11c   :  { %643 = vrsqrt.f32 %v91_v41  ;;  %vm99_vm7 = vweird.f32 %v91_v41 }
 0x121   :  { %v90_v42 = vpop.xlane.xlu1 %89 }
 0x122   :  { %v644_v43 = vpop.eup %643  ;;  %v92_v44 = vmax.f32 %v90_v42, 1e-30 }
 0x123   :  { %v94_v45 = vmul.f32 %v644_v43, %v91_v41  ;;  %vm100_vm6 = vweird.f32 %v644_v43 }
 0x124   :  { %645 = vrsqrt.f32 %v92_v44  ;;  %vm101_vm8 = vmor %vm99_vm7, %vm100_vm6  ;;  %vm109_vm11 = vweird.f32 %v92_v44 }
 0x125   :  { %v95_v46 = vmul.f32 %v644_v43, %v94_v45 }
 0x127   :  { %v96_v47 = vmul.f32 0.5, %v95_v46 }
 0x129   :  { %v97_v48 = vsub.f32 1.5, %v96_v47 }
 0x12a   :  { %v646_v49 = vpop.eup %645 }
 0x12b   :  { %v104_v50 = vmul.f32 %v646_v49, %v92_v44  ;;  %v98_v51 = vmul.f32 %v644_v43, %v97_v48  ;;  %vm110_vm10 = vweird.f32 %v646_v49 }
 0x12c   :  { %vm111_vm12 = vmor %vm109_vm11, %vm110_vm10 }
 0x12d   :  { %v105_v52 = vmul.f32 %v646_v49, %v104_v50  ;;  %v102_v53 = vsel %vm101_vm8, %v644_v43, %v98_v51 }
 0x12e   :  { %v113_v54 = vmul.f32 %v102_v53, %v91_v41  ;;  %v117_v55 = vmul.f32 0.996, %v102_v53 }
 0x12f   :  { %v106_v56 = vmul.f32 0.5, %v105_v52 }
 0x130   :  { %vm115_vm9 = vcmp.gt.f32.partialorder %v113_v54, 0.996  ;;  %v119_v57 = vmul.f32 %v117_v55, %v83_v26 }
 0x131   :  { %v107_v58 = vsub.f32 1.5, %v106_v56 }
 0x132   :  { %v125_v59 = vsel %vm115_vm9, %v119_v57, %v83_v26 }
 0x133   :  { %v144_v60 = vmul.f32 %v125_v59, %v125_v59  ;;  %v108_v61 = vmul.f32 %v646_v49, %v107_v58 }
 0x135   :  { %146 = vadd.xlane.f32.xlu2 %v144_v60  ;;  %v112_v62 = vsel %vm111_vm12, %v646_v49, %v108_v61 }
 0x136   :  { %v114_v63 = vmul.f32 %v112_v62, %v92_v44  ;;  %v118_v0 = vmul.f32 0.996, %v112_v62 }
 0x138   :  { %vm116_vm13 = vcmp.gt.f32.partialorder %v114_v63, 0.996  ;;  %v120_v1 = vmul.f32 %v118_v0, %v84_v30 }
 0x13a   :  { %v126_v2 = vsel %vm116_vm13, %v120_v1, %v84_v30 }
 0x13b   :  { %v174_v3 = vpack.c.bf16 %v126_v2, %v125_v59  ;;  %v145_v4 = vmul.f32 %v126_v2, %v126_v2 }
 0x13d   :  { %231 = vmatmul.bf16.vlgmr.msra.gmra.mxu0 %v174_v3  ;;  %148 = vadd.xlane.f32.xlu2 %v145_v4 }
 0x1a8   :  { %v147_v9 = vpop.xlane.xlu2 %146 }
 0x1a9   :  { %v150_v10 = vmax.f32 %v147_v9, 1e-30 }
 0x1ab   :  { %647 = vrsqrt.f32 %v150_v10  ;;  %vm158_vm15 = vweird.f32 %v150_v10 }
 0x1b0   :  { %v149_v11 = vpop.xlane.xlu2 %148 }
 0x1b1   :  { %v151_v12 = vmax.f32 %v149_v11, 1e-30  ;;  %v648_v13 = vpop.eup %647 }
 0x1b2   :  { %v153_v14 = vmul.f32 %v648_v13, %v150_v10  ;;  %vm159_vm14 = vweird.f32 %v648_v13 }
 0x1b3   :  { %649 = vrsqrt.f32 %v151_v12  ;;  %vm160_vm0 = vmor %vm158_vm15, %vm159_vm14  ;;  %vm168_vm2 = vweird.f32 %v151_v12 }
 0x1b4   :  { %v154_v15 = vmul.f32 %v648_v13, %v153_v14 }
 0x1b6   :  { %v155_v17 = vmul.f32 0.5, %v154_v15 }
 0x1b8   :  { %v156_v19 = vsub.f32 1.5, %v155_v17 }
 0x1b9   :  { %v650_v16 = vpop.eup %649 }
 0x1ba   :  { %v805_v5 = vpop.f32.mrf.mxu0  ;;  %v163_v18 = vmul.f32 %v650_v16, %v151_v12  ;;  %v157_v21 = vmul.f32 %v648_v13, %v156_v19  ;;  %vm169_vm1 = vweird.f32 %v650_v16 }
 0x1bb   :  { %v237_v6 = vmul.f32 %v805_v5, %v805_v5  ;;  %vm170_vm3 = vmor %vm168_vm2, %vm169_vm1  ;;  %vm370_vm2 = vcmask 1040384  }
 0x1bc   :  { %v164_v20 = vmul.f32 %v650_v16, %v163_v18  ;;  %v813_v23 = vsel %vm160_vm0, %v648_v13, %v157_v21 }
 0x1bd   :  { %239 = vadd.xlane.f32.xlu0 %v237_v6  ;;  %v172_v25 = vmul.f32 %v813_v23, %v150_v10 }
 0x1be   :  { %v165_v22 = vmul.f32 0.5, %v164_v20 }
 0x1bf   :  { %v269_v27 = vmax.f32 %v172_v25, 0.0 }
 0x1c0   :  { %v166_v24 = vsub.f32 1.5, %v165_v22 }
 0x1c1   :  { %v271_v29 = vmin.f32 %v269_v27, 0.9999999 }
 0x1c2   :  { %v809_v7 = vpop.f32.mrf.mxu0  ;;  %v167_v26 = vmul.f32 %v650_v16, %v166_v24 }
 0x1c3   :  { %v238_v8 = vmul.f32 %v809_v7, %v809_v7  ;;  %v275_v31 = vsub.f32 1.0, %v271_v29  ;;  %v273_v51 = vadd.f32 1.0, %v271_v29 }
 0x1c4   :  { %v816_v28 = vsel %vm170_vm3, %v650_v16, %v167_v26 }
 0x1c5   :  { %241 = vadd.xlane.f32.xlu1 %v238_v8  ;;  %v173_v30 = vmul.f32 %v816_v28, %v151_v12  ;;  %651 = vrcp.f32 %v275_v31  ;;  %v288_v43 = vand.u32 2147483648, %v275_v31  ;;  %vm282_vm5 = vweird.f32 %v275_v31 }
 0x1c6   :  { %v286_v44 = vand.u32 2147483647, %v275_v31 }
 0x1c7   :  { %v270_v32 = vmax.f32 %v173_v30, 0.0  ;;  %v289_v48 = vor.u32 1.1754944e-38, %v288_v43 }
 0x1c8   :  { %vm287_vm7 = vcmp.eq.f32.partialorder %v286_v44, 8.507059e+37 }
 0x1c9   :  { %v272_v33 = vmin.f32 %v270_v32, 0.9999999 }
 0x1cb   :  { %v276_v34 = vsub.f32 1.0, %v272_v33  ;;  %v652_v35 = vpop.eup %651  ;;  %v274_v63 = vadd.f32 1.0, %v272_v33 }
 0x1cc   :  { %v278_v36 = vmul.f32 %v652_v35, %v275_v31  ;;  %vm283_vm4 = vweird.f32 %v652_v35 }
 0x1cd   :  { %653 = vrcp.f32 %v276_v34  ;;  %vm284_vm6 = vmor %vm282_vm5, %vm283_vm4  ;;  %v303_v53 = vand.u32 2147483648, %v276_v34  ;;  %vm297_vm9 = vweird.f32 %v276_v34  ;;  %v301_v55 = vand.u32 2147483647, %v276_v34 }
 0x1ce   :  { %v279_v37 = vsub.f32 1.0, %v278_v36  ;;  %v143_v36 = vld [vmem:[%s853_s2] sm:$0x1] }
 0x1cf   :  { %v304_v59 = vor.u32 1.1754944e-38, %v303_v53  ;;  %vm302_vm11 = vcmp.eq.f32.partialorder %v301_v55, 8.507059e+37  ;;  %v829_v53 = vld [vmem:[%s853_s2] ss:$0 sm:$0xff]  ;;  %s775_s2 = smov [#allocation7]  }
 0x1d0   :  { %v280_v39 = vmul.f32 %v652_v35, %v279_v37  ;;  %s566_s28 = sshll.u32 %s775_s2, 4  ;;  %s567_s28 = int_to_ptr.vmem [resolvable:$true] %s566_s28 }
 0x1d2   :  { %v281_v41 = vadd.f32 %v652_v35, %v280_v39 }
 0x1d3   :  { %v654_v38 = vpop.eup %653 }
 0x1d4   :  { %v293_v40 = vmul.f32 %v654_v38, %v276_v34  ;;  %v285_v45 = vsel %vm284_vm6, %v652_v35, %v281_v41  ;;  %vm298_vm8 = vweird.f32 %v654_v38 }
 0x1d5   :  { %v290_v50 = vsel %vm287_vm7, %v289_v48, %v285_v45  ;;  %vm299_vm10 = vmor %vm297_vm9, %vm298_vm8 }
 0x1d6   :  { %v294_v42 = vsub.f32 1.0, %v293_v40  ;;  %v291_v54 = vmul.f32 %v290_v50, %v273_v51 }
 0x1d8   :  { %v295_v46 = vmul.f32 %v654_v38, %v294_v42 }
 0x1da   :  { %v296_v52 = vadd.f32 %v654_v38, %v295_v46 }
 0x1dc   :  { %v300_v56 = vsel %vm299_vm10, %v654_v38, %v296_v52 }
 0x1dd   :  { %v305_v62 = vsel %vm302_vm11, %v304_v59, %v300_v56 }
 0x1de   :  { %v306_v1 = vmul.f32 %v305_v62, %v274_v63 }
 0x230   :  { %v240_v47 = vpop.xlane.xlu0 %239 }
 0x231   :  { %v243_v49 = vmax.f32 %v240_v47, 1e-30 }
 0x233   :  { %655 = vrsqrt.f32 %v243_v49  ;;  %vm251_vm13 = vweird.f32 %v243_v49 }
 0x234   :  { %657 = vlog2.f32 %v291_v54 }
 0x238   :  { %v242_v57 = vpop.xlane.xlu1 %241 }
 0x239   :  { %v656_v58 = vpop.eup %655  ;;  %v244_v60 = vmax.f32 %v242_v57, 1e-30 }
 0x23a   :  { %v246_v61 = vmul.f32 %v656_v58, %v243_v49  ;;  %v658_v3 = vpop.eup %657  ;;  %vm252_vm12 = vweird.f32 %v656_v58 }
 0x23b   :  { %659 = vrsqrt.f32 %v244_v60  ;;  %v308_v10 = vmul.f32 0.6931472, %v658_v3  ;;  %vm253_vm14 = vmor %vm251_vm13, %vm252_vm12  ;;  %vm261_vm0 = vweird.f32 %v244_v60 }
 0x23c   :  { %v247_v0 = vmul.f32 %v656_v58, %v246_v61  ;;  %661 = vlog2.f32 %v306_v1 }
 0x23d   :  { %v311_v15 = vmul.f32 0.5, %v308_v10 }
 0x23e   :  { %v248_v2 = vmul.f32 0.5, %v247_v0 }
 0x240   :  { %v249_v4 = vsub.f32 1.5, %v248_v2 }
 0x241   :  { %v660_v6 = vpop.eup %659 }
 0x242   :  { %v250_v8 = vmul.f32 %v656_v58, %v249_v4  ;;  %v256_v9 = vmul.f32 %v660_v6, %v244_v60  ;;  %v662_v17 = vpop.eup %661  ;;  %vm262_vm15 = vweird.f32 %v660_v6 }
 0x243   :  { %vm263_vm1 = vmor %vm261_vm0, %vm262_vm15  ;;  %v310_v21 = vmul.f32 0.6931472, %v662_v17 }
 0x244   :  { %v254_v11 = vsel %vm253_vm14, %v656_v58, %v250_v8  ;;  %v257_v12 = vmul.f32 %v660_v6, %v256_v9 }
 0x245   :  { %v265_v13 = vmul.f32 %v254_v11, %v243_v49  ;;  %v312_v26 = vmul.f32 0.5, %v310_v21 }
 0x246   :  { %v258_v14 = vmul.f32 0.5, %v257_v12 }
 0x247   :  { %v267_v16 = vmul.f32 %v265_v13, %v813_v23 }
 0x248   :  { %v259_v18 = vsub.f32 1.5, %v258_v14 }
 0x249   :  { %v313_v19 = vmul.f32 %v311_v15, %v267_v16 }
 0x24a   :  { %v260_v20 = vmul.f32 %v660_v6, %v259_v18 }
 0x24b   :  { %663 = vtanh.f32 %v313_v19 }
 0x24c   :  { %v264_v22 = vsel %vm263_vm1, %v660_v6, %v260_v20 }
 0x24d   :  { %v266_v24 = vmul.f32 %v264_v22, %v244_v60 }
 0x24f   :  { %v268_v25 = vmul.f32 %v266_v24, %v816_v28  ;;  %v369_v28 = vmul.f32 %v143_v36, %v143_v36 }
 0x251   :  { %v664_v27 = vpop.eup %663  ;;  %v314_v29 = vmul.f32 %v312_v26, %v268_v25  ;;  %v371_v37 = vsel %vm370_vm2, %v369_v28, 0.0 }
 0x252   :  { %v317_v30 = vmul.f32 %v664_v27, %v254_v11  ;;  %372 = vadd.xlane.f32.xlu1 %v371_v37 }
 0x253   :  { %665 = vtanh.f32 %v314_v29 }
 0x254   :  { %v319_v23 = vmul.f32 %v317_v30, %v805_v5 }
 0x256   :  { %v321_v31 = vmul.f32 %v319_v23, %v319_v23 }
 0x258   :  { %323 = vadd.xlane.f32.xlu2 %v321_v31 }
 0x259   :  { %v666_v32 = vpop.eup %665 }
 0x25a   :  { %v318_v33 = vmul.f32 %v666_v32, %v264_v22 }
 0x25c   :  { %v320_v34 = vmul.f32 %v318_v33, %v809_v7 }
 0x25e   :  { %v322_v35 = vmul.f32 %v320_v34, %v320_v34 }
 0x260   :  { %325 = vadd.xlane.f32.xlu0 %v322_v35 }
 0x2c5   :  { %v373_v3 = vpop.xlane.xlu1 %372 }
 0x2c6   :  { %v401_v4 = vperm.slane %v373_v3, 0  ;;  %v387_v14 = vmul.f32 -1.0, %v373_v3 }
 0x2c8   :  { %v388_v20 = vperm.slane %v387_v14, 0 }
 0x2cb   :  { %v324_v38 = vpop.xlane.xlu2 %323 }
 0x2cc   :  { %v327_v39 = vmax.f32 %v324_v38, 1e-30 }
 0x2ce   :  { %667 = vrsqrt.f32 %v327_v39  ;;  %vm335_vm4 = vweird.f32 %v327_v39 }
 0x2d3   :  { %v326_v5 = vpop.xlane.xlu0 %325 }
 0x2d4   :  { %v668_v40 = vpop.eup %667  ;;  %v328_v41 = vmax.f32 %v326_v5, 1e-30 }
 0x2d5   :  { %v330_v42 = vmul.f32 %v668_v40, %v327_v39  ;;  %vm336_vm3 = vweird.f32 %v668_v40 }
 0x2d6   :  { %669 = vrsqrt.f32 %v328_v41  ;;  %vm337_vm5 = vmor %vm335_vm4, %vm336_vm3  ;;  %vm345_vm8 = vweird.f32 %v328_v41 }
 0x2d7   :  { %v331_v43 = vmul.f32 %v668_v40, %v330_v42 }
 0x2d9   :  { %v332_v7 = vmul.f32 0.5, %v331_v43 }
 0x2db   :  { %v333_v44 = vsub.f32 1.5, %v332_v7 }
 0x2dc   :  { %v670_v45 = vpop.eup %669 }
 0x2dd   :  { %v340_v46 = vmul.f32 %v670_v45, %v328_v41  ;;  %v334_v47 = vmul.f32 %v668_v40, %v333_v44  ;;  %vm346_vm7 = vweird.f32 %v670_v45 }
 0x2de   :  { %vm347_vm9 = vmor %vm345_vm8, %vm346_vm7 }
 0x2df   :  { %v341_v48 = vmul.f32 %v670_v45, %v340_v46  ;;  %v338_v49 = vsel %vm337_vm5, %v668_v40, %v334_v47 }
 0x2e0   :  { %v349_v50 = vmul.f32 %v338_v49, %v327_v39  ;;  %v353_v51 = vmul.f32 0.996, %v338_v49 }
 0x2e1   :  { %v342_v52 = vmul.f32 0.5, %v341_v48 }
 0x2e2   :  { %vm351_vm6 = vcmp.gt.f32.partialorder %v349_v50, 0.996  ;;  %v355_v54 = vmul.f32 %v353_v51, %v319_v23 }
 0x2e3   :  { %v343_v55 = vsub.f32 1.5, %v342_v52 }
 0x2e4   :  { %v361_v56 = vsel %vm351_vm6, %v355_v54, %v319_v23 }
 0x2e5   :  { %v377_v57 = vmul.f32 %v829_v53, %v361_v56  ;;  %v363_v58 = vmul.f32 %v361_v56, %v361_v56  ;;  %v344_v59 = vmul.f32 %v670_v45, %v343_v55 }
 0x2e7   :  { %379 = vadd.xlane.f32.xlu2 %v377_v57  ;;  %365 = vadd.xlane.f32.xlu1 %v363_v58  ;;  %v348_v60 = vsel %vm347_vm9, %v670_v45, %v344_v59 }
 0x2e8   :  { %v350_v61 = vmul.f32 %v348_v60, %v328_v41  ;;  %v354_v62 = vmul.f32 0.996, %v348_v60 }
 0x2ea   :  { %vm352_vm10 = vcmp.gt.f32.partialorder %v350_v61, 0.996  ;;  %v356_v63 = vmul.f32 %v354_v62, %v320_v34 }
 0x2ec   :  { %v362_v0 = vsel %vm352_vm10, %v356_v63, %v320_v34 }
 0x2ed   :  { %v378_v1 = vmul.f32 %v829_v53, %v362_v0  ;;  %v364_v2 = vmul.f32 %v362_v0, %v362_v0 }
 0x2ef   :  { %381 = vadd.xlane.f32.xlu0 %v378_v1  ;;  %367 = vadd.xlane.f32.xlu2 %v364_v2 }
 0x35a   :  { %v380_v6 = vpop.xlane.xlu2 %379  ;;  %v366_v8 = vpop.xlane.xlu1 %365 }
 0x35b   :  { %v383_v9 = vmul.f32 -2.0, %v380_v6  ;;  %v402_v11 = vmul.f32 %v401_v4, %v366_v8  ;;  %v393_v22 = vmul.f32 -1.0, %v366_v8 }
 0x35d   :  { %v385_v10 = vsub.f32 1.0, %v383_v9  ;;  %v395_v29 = vadd.f32 1.0, %v393_v22 }
 0x35f   :  { %v404_v12 = vadd.f32 %v402_v11, %v385_v10  ;;  %v389_v26 = vsub.f32 %v385_v10, %v388_v20  ;;  %v397_v34 = vmul.f32 %v829_v53, %v395_v29 }
 0x361   :  { %v406_v13 = vmax.f32 %v404_v12, 1e-15  ;;  %v391_v31 = vmul.f32 %v389_v26, %v361_v56 }
 0x362   :  { %v382_v15 = vpop.xlane.xlu0 %381  ;;  %v368_v16 = vpop.xlane.xlu2 %367 }
 0x363   :  { %671 = vrcp.f32 %v406_v13  ;;  %v384_v17 = vmul.f32 -2.0, %v382_v15  ;;  %v403_v19 = vmul.f32 %v401_v4, %v368_v16  ;;  %v419_v23 = vand.u32 2147483648, %v406_v13 }
 0x364   :  { %v417_v33 = vand.u32 2147483647, %v406_v13  ;;  %v394_v35 = vmul.f32 -1.0, %v368_v16  ;;  %vm413_vm12 = vweird.f32 %v406_v13  ;;  %v399_v39 = vadd.f32 %v397_v34, %v391_v31 }
 0x365   :  { %v386_v18 = vsub.f32 1.0, %v384_v17  ;;  %v420_v38 = vor.u32 1.1754944e-38, %v419_v23 }
 0x366   :  { %vm418_vm14 = vcmp.eq.f32.partialorder %v417_v33, 8.507059e+37  ;;  %v396_v42 = vadd.f32 1.0, %v394_v35 }
 0x367   :  { %v405_v21 = vadd.f32 %v403_v19, %v386_v18  ;;  %v390_v37 = vsub.f32 %v386_v18, %v388_v20 }
 0x368   :  { %v398_v49 = vmul.f32 %v829_v53, %v396_v42 }
 0x369   :  { %v672_v24 = vpop.eup %671  ;;  %v407_v25 = vmax.f32 %v405_v21, 1e-15  ;;  %v392_v44 = vmul.f32 %v390_v37, %v362_v0 }
 0x36a   :  { %v409_v27 = vmul.f32 %v672_v24, %v406_v13  ;;  %vm414_vm11 = vweird.f32 %v672_v24 }
 0x36b   :  { %673 = vrcp.f32 %v407_v25  ;;  %vm415_vm13 = vmor %vm413_vm12, %vm414_vm11  ;;  %v434_v45 = vand.u32 2147483648, %v407_v25  ;;  %v432_v48 = vand.u32 2147483647, %v407_v25  ;;  %vm428_vm0 = vweird.f32 %v407_v25 }
 0x36c   :  { %v410_v30 = vsub.f32 1.0, %v409_v27  ;;  %v400_v52 = vadd.f32 %v398_v49, %v392_v44 }
 0x36d   :  { %v435_v51 = vor.u32 1.1754944e-38, %v434_v45  ;;  %vm433_vm2 = vcmp.eq.f32.partialorder %v432_v48, 8.507059e+37 }
 0x36e   :  { %v411_v32 = vmul.f32 %v672_v24, %v410_v30 }
 0x370   :  { %v412_v36 = vadd.f32 %v672_v24, %v411_v32 }
 0x371   :  { %v674_v28 = vpop.eup %673 }
 0x372   :  { %v424_v5 = vmul.f32 %v674_v28, %v407_v25  ;;  %v416_v40 = vsel %vm415_vm13, %v672_v24, %v412_v36  ;;  %vm429_vm15 = vweird.f32 %v674_v28 }
 0x373   :  { %v421_v41 = vsel %vm418_vm14, %v420_v38, %v416_v40  ;;  %vm430_vm1 = vmor %vm428_vm0, %vm429_vm15 }
 0x374   :  { %v425_v43 = vsub.f32 1.0, %v424_v5  ;;  %v422_v7 = vmul.f32 %v421_v41, %v399_v39 }
 0x376   :  { %v438_v46 = vmul.f32 %v422_v7, %v422_v7  ;;  %v426_v47 = vmul.f32 %v674_v28, %v425_v43 }
 0x378   :  { %440 = vadd.xlane.f32.xlu0 %v438_v46  ;;  %v427_v50 = vadd.f32 %v674_v28, %v426_v47 }
 0x37a   :  { %v431_v54 = vsel %vm430_vm1, %v674_v28, %v427_v50 }
 0x37b   :  { %v436_v55 = vsel %vm433_vm2, %v435_v51, %v431_v54 }
 0x37c   :  { %v437_v56 = vmul.f32 %v436_v55, %v400_v52 }
 0x37e   :  { %v439_v57 = vmul.f32 %v437_v56, %v437_v56 }
 0x380   :  { %442 = vadd.xlane.f32.xlu1 %v439_v57 }
 0x3eb   :  { %v441_v58 = vpop.xlane.xlu0 %440 }
 0x3ec   :  { %v444_v59 = vmax.f32 %v441_v58, 1e-30 }
 0x3ee   :  { %675 = vrsqrt.f32 %v444_v59  ;;  %vm452_vm4 = vweird.f32 %v444_v59 }
 0x3f3   :  { %v443_v60 = vpop.xlane.xlu1 %442 }
 0x3f4   :  { %v676_v61 = vpop.eup %675  ;;  %v445_v62 = vmax.f32 %v443_v60, 1e-30 }
 0x3f5   :  { %v447_v63 = vmul.f32 %v676_v61, %v444_v59  ;;  %vm453_vm3 = vweird.f32 %v676_v61 }
 0x3f6   :  { %677 = vrsqrt.f32 %v445_v62  ;;  %vm454_vm5 = vmor %vm452_vm4, %vm453_vm3  ;;  %vm462_vm8 = vweird.f32 %v445_v62 }
 0x3f7   :  { %v448_v53 = vmul.f32 %v676_v61, %v447_v63 }
 0x3f9   :  { %v449_v0 = vmul.f32 0.5, %v448_v53 }
 0x3fb   :  { %v450_v1 = vsub.f32 1.5, %v449_v0 }
 0x3fc   :  { %v678_v2 = vpop.eup %677 }
 0x3fd   :  { %v457_v3 = vmul.f32 %v678_v2, %v445_v62  ;;  %v451_v4 = vmul.f32 %v676_v61, %v450_v1  ;;  %vm463_vm7 = vweird.f32 %v678_v2 }
 0x3fe   :  { %vm464_vm9 = vmor %vm462_vm8, %vm463_vm7 }
 0x3ff   :  { %v458_v6 = vmul.f32 %v678_v2, %v457_v3  ;;  %v455_v8 = vsel %vm454_vm5, %v676_v61, %v451_v4 }
 0x400   :  { %v466_v9 = vmul.f32 %v455_v8, %v444_v59  ;;  %v470_v10 = vmul.f32 0.996, %v455_v8 }
 0x401   :  { %v459_v11 = vmul.f32 0.5, %v458_v6 }
 0x402   :  { %vm468_vm6 = vcmp.gt.f32.partialorder %v466_v9, 0.996  ;;  %v472_v12 = vmul.f32 %v470_v10, %v422_v7 }
 0x403   :  { %v460_v13 = vsub.f32 1.5, %v459_v11 }
 0x404   :  { %v835_v14 = vsel %vm468_vm6, %v472_v12, %v422_v7 }
 0x405   :  { %v480_v15 = vmul.f32 %v835_v14, %v835_v14  ;;  %v461_v16 = vmul.f32 %v678_v2, %v460_v13 }
 0x407   :  { %482 = vadd.xlane.f32.xlu2 %v480_v15  ;;  %v465_v17 = vsel %vm464_vm9, %v678_v2, %v461_v16 }
 0x408   :  { %v467_v18 = vmul.f32 %v465_v17, %v445_v62  ;;  %v471_v19 = vmul.f32 0.996, %v465_v17 }
 0x40a   :  { %vm469_vm10 = vcmp.gt.f32.partialorder %v467_v18, 0.996  ;;  %v473_v20 = vmul.f32 %v471_v19, %v437_v56 }
 0x40c   :  { %v839_v21 = vsel %vm469_vm10, %v473_v20, %v437_v56 }
 0x40d   :  { %v481_v22 = vmul.f32 %v839_v21, %v839_v21 }
 0x40f   :  { %484 = vadd.xlane.f32.xlu0 %v481_v22 }
 0x47a   :  { %v483_v24 = vpop.xlane.xlu2 %482 }
 0x47b   :  { %v486_v25 = vmax.f32 %v483_v24, 1e-30 }
 0x47d   :  { %679 = vrsqrt.f32 %v486_v25  ;;  %vm494_vm12 = vweird.f32 %v486_v25 }
 0x482   :  { %v485_v26 = vpop.xlane.xlu0 %484 }
 0x483   :  { %v680_v27 = vpop.eup %679  ;;  %v487_v29 = vmax.f32 %v485_v26, 1e-30 }
 0x484   :  { %v489_v30 = vmul.f32 %v680_v27, %v486_v25  ;;  %vm495_vm11 = vweird.f32 %v680_v27 }
 0x485   :  { %681 = vrsqrt.f32 %v487_v29  ;;  %vm496_vm13 = vmor %vm494_vm12, %vm495_vm11  ;;  %vm504_vm15 = vweird.f32 %v487_v29 }
 0x486   :  { %v490_v23 = vmul.f32 %v680_v27, %v489_v30 }
 0x488   :  { %v491_v31 = vmul.f32 0.5, %v490_v23 }
 0x48a   :  { %v492_v32 = vsub.f32 1.5, %v491_v31 }
 0x48b   :  { %v682_v33 = vpop.eup %681 }
 0x48c   :  { %v493_v34 = vmul.f32 %v680_v27, %v492_v32  ;;  %v499_v35 = vmul.f32 %v682_v33, %v487_v29  ;;  %vm505_vm14 = vweird.f32 %v682_v33 }
 0x48d   :  { %vm506_vm0 = vmor %vm504_vm15, %vm505_vm14 }
 0x48e   :  { %v497_v36 = vsel %vm496_vm13, %v680_v27, %v493_v34  ;;  %v500_v28 = vmul.f32 %v682_v33, %v499_v35 }
 0x48f   :  { %v508_v37 = vmul.f32 %v497_v36, %v486_v25 }
 0x490   :  { %v501_v38 = vmul.f32 0.5, %v500_v28 }
 0x491   :  { %v510_v39 = vmax.f32 %v508_v37, 0.0 }
 0x492   :  { %v502_v5 = vsub.f32 1.5, %v501_v38 }
 0x493   :  { %v512_v40 = vmin.f32 %v510_v39, 0.9999999 }
 0x494   :  { %v503_v41 = vmul.f32 %v682_v33, %v502_v5 }
 0x495   :  { %v516_v42 = vsub.f32 1.0, %v512_v40  ;;  %v514_v57 = vadd.f32 1.0, %v512_v40 }
 0x496   :  { %v507_v43 = vsel %vm506_vm0, %v682_v33, %v503_v41 }
 0x497   :  { %683 = vrcp.f32 %v516_v42  ;;  %v509_v7 = vmul.f32 %v507_v43, %v487_v29  ;;  %v529_v50 = vand.u32 2147483648, %v516_v42  ;;  %v527_v52 = vand.u32 2147483647, %v516_v42 }
 0x498   :  { %vm523_vm2 = vweird.f32 %v516_v42 }
 0x499   :  { %v511_v44 = vmax.f32 %v509_v7, 0.0  ;;  %v530_v55 = vor.u32 1.1754944e-38, %v529_v50  ;;  %vm528_vm4 = vcmp.eq.f32.partialorder %v527_v52, 8.507059e+37 }
 0x49b   :  { %v513_v45 = vmin.f32 %v511_v44, 0.9999999 }
 0x49d   :  { %v684_v46 = vpop.eup %683  ;;  %v517_v48 = vsub.f32 1.0, %v513_v45  ;;  %v515_v3 = vadd.f32 1.0, %v513_v45 }
 0x49e   :  { %v519_v47 = vmul.f32 %v684_v46, %v516_v42  ;;  %vm524_vm1 = vweird.f32 %v684_v46 }
 0x49f   :  { %685 = vrcp.f32 %v517_v48  ;;  %vm525_vm3 = vmor %vm523_vm2, %vm524_vm1  ;;  %v544_v63 = vand.u32 2147483648, %v517_v48  ;;  %v542_v0 = vand.u32 2147483647, %v517_v48  ;;  %vm538_vm6 = vweird.f32 %v517_v48 }
 0x4a0   :  { %v520_v49 = vsub.f32 1.0, %v519_v47 }
 0x4a1   :  { %v545_v2 = vor.u32 1.1754944e-38, %v544_v63  ;;  %vm543_vm8 = vcmp.eq.f32.partialorder %v542_v0, 8.507059e+37 }
 0x4a2   :  { %v521_v51 = vmul.f32 %v684_v46, %v520_v49 }
 0x4a4   :  { %v522_v54 = vadd.f32 %v684_v46, %v521_v51 }
 0x4a5   :  { %v686_v56 = vpop.eup %685 }
 0x4a6   :  { %v526_v58 = vsel %vm525_vm3, %v684_v46, %v522_v54  ;;  %v534_v60 = vmul.f32 %v686_v56, %v517_v48  ;;  %vm539_vm5 = vweird.f32 %v686_v56 }
 0x4a7   :  { %v531_v59 = vsel %vm528_vm4, %v530_v55, %v526_v58  ;;  %vm540_vm7 = vmor %vm538_vm6, %vm539_vm5 }
 0x4a8   :  { %v532_v61 = vmul.f32 %v531_v59, %v514_v57  ;;  %v535_v62 = vsub.f32 1.0, %v534_v60 }
 0x4aa   :  { %687 = vlog2.f32 %v532_v61  ;;  %v536_v53 = vmul.f32 %v686_v56, %v535_v62 }
 0x4ac   :  { %v537_v1 = vadd.f32 %v686_v56, %v536_v53 }
 0x4ae   :  { %v541_v4 = vsel %vm540_vm7, %v686_v56, %v537_v1 }
 0x4af   :  { %v546_v6 = vsel %vm543_vm8, %v545_v2, %v541_v4 }
 0x4b0   :  { %v688_v8 = vpop.eup %687  ;;  %v547_v9 = vmul.f32 %v546_v6, %v515_v3 }
 0x4b1   :  { %v549_v10 = vmul.f32 0.6931472, %v688_v8 }
 0x4b2   :  { %689 = vlog2.f32 %v547_v9 }
 0x4b3   :  { %v552_v11 = vmul.f32 0.5, %v549_v10 }
 0x4b5   :  { %v554_v16 = vmul.f32 %v552_v11, %v497_v36 }
 0x4b7   :  { %v556_v18 = vmul.f32 %v554_v16, %v835_v14 }
 0x4b8   :  { %v690_v12 = vpop.eup %689 }
 0x4b9   :  { %v551_v13 = vmul.f32 0.6931472, %v690_v12 }
 0x4bb   :  { %v553_v15 = vmul.f32 0.5, %v551_v13 }
 0x4bd   :  { %v555_v17 = vmul.f32 %v553_v15, %v507_v43 }
 0x4bf   :  { %v557_v19 = vmul.f32 %v555_v17, %v839_v21 }
 0x4c1   :  { %v625_v20 = vpack.c.bf16 %v557_v19, %v556_v18 }
 0x4c3   :  { %626 = vst [vmem:[#allocation7] sm:$0xff] %v625_v20  }
 0x4c4   :  { %574 = dma.vmem_to_hbm [thread:$0]  %s567_s28, 128, %s569_s4, [#allocation4], %s773_s24, %s773_s24, %s774_s25  }
 0x4c5   :  { %767 = dma.done.wait [#allocation4], 128  }
 0x4c6   :  { %768 = vsyncadd [#allocation4], 4294967168 }
 0x4c7   :  { %579 = vsyncpa [#allocation3], 1 }
 0x4c8   :  { %580 = vsyncpa [#allocation6], 1 }
 0x4c9   :  { %581 = vsyncpa [#allocation4], 1 }

</bundles_post_ra>
